<compile_context>
chip_gen: v6e
topology: v6e:2x2x1
jax: 0.10.0
libtpu: 0.0.40
codegen_flags: <defaults>
</compile_context>

<pallas_src>
import math

import jax
import jax.numpy as jnp
from jax import lax
from jax.experimental import pallas as pl
from jax.experimental.pallas import tpu as pltpu


def _round_up(x, m):
    return ((x + m - 1) // m) * m


# Tile defaults. Double-buffered per-step VMEM footprint with these sizes is ~1.5 MiB,
# comfortably inside v5e/v6e (128 MiB) and v7x (64 MiB) VMEM.
EVAL_TM = 256     # user rows per eval tile (multiple of 8)
EVAL_TN = 512     # bundle columns per eval tile (multiple of 128 -> lane-dense stores)
LOSS_TB = 512     # batch rows per loss tile (multiple of 8)


# ---------------------------------------------------------------------------
# Kernel 1: BPR pairwise loss (mul + reduce + softplus + mean) and L2 term.
# Batch-tiled reduction with VMEM (1,1) accumulators.
# ---------------------------------------------------------------------------
def _bpr_loss_kernel(params_ref, nvalid_ref, iu_ref, ipos_ref, ineg_ref,
                     loss_ref, l2_ref, acc_sp_ref, acc_reg_ref):
    t = pl.program_id(0)

    @pl.when(t == 0)
    def _init():
        acc_sp_ref[...] = jnp.zeros_like(acc_sp_ref)
        acc_reg_ref[...] = jnp.zeros_like(acc_reg_ref)

    iu = iu_ref[...]      # (tb, D) user embeddings for this batch tile
    ipos = ipos_ref[...]  # (tb, D) bundles[:, 0] embeddings
    ineg = ineg_ref[...]  # (tb, D) bundles[:, 1] embeddings
    tb = iu.shape[0]

    # score = sum(i_u * i_b, dim=-1): col 0 from bundles[:,0], col 1 from bundles[:,1]
    s0 = jnp.sum(iu * ipos, axis=-1, keepdims=True)   # (tb, 1)
    s1 = jnp.sum(iu * ineg, axis=-1, keepdims=True)   # (tb, 1)
    x = s1 - s0                                        # score[:, 1] - score[:, 0]

    # numerically stable softplus == torch.nn.functional.softplus
    sp = jnp.maximum(x, 0.0) + jnp.log1p(jnp.exp(-jnp.abs(x)))

    # mask padded rows (padded with zeros -> softplus(0)=log 2 would leak otherwise)
    row = t * tb + lax.broadcasted_iota(jnp.int32, (tb, 1), 0)
    sp = jnp.where(row < nvalid_ref[0], sp, 0.0)

    acc_sp_ref[...] += jnp.sum(sp, axis=0, keepdims=True)
    # TODO(synk): HGT.reg_loss() source not provided; standard BPR L2 of the gathered
    # batch embeddings (0.5 * sum(||e||^2) / batch_size). Padded rows are zero -> no-op.
    acc_reg_ref[...] += 0.5 * (jnp.sum(iu * iu, keepdims=True)
                               + jnp.sum(ipos * ipos, keepdims=True)
                               + jnp.sum(ineg * ineg, keepdims=True))

    @pl.when(t == pl.num_programs(0) - 1)
    def _finalize():
        l2w = params_ref[0]     # runtime l2 weight (SMEM scalar)
        inv_b = params_ref[1]   # 1 / global_batch_size (SMEM scalar)
        bpr = acc_sp_ref[...] * inv_b
        l2 = acc_reg_ref[...] * inv_b * l2w
        l2_ref[...] = l2
        loss_ref[...] = bpr + l2


def bpr_loss_pallas(i_u, i_pos, i_neg, l2_weight, batch_size, *, tb=LOSS_TB):
    B, D = i_u.shape
    tb = min(tb, _round_up(B, 8))
    B_pad = _round_up(B, tb)
    if B_pad != B:
        pad = ((0, B_pad - B), (0, 0))
        i_u = jnp.pad(i_u, pad)
        i_pos = jnp.pad(i_pos, pad)
        i_neg = jnp.pad(i_neg, pad)

    params = jnp.array([float(l2_weight), 1.0 / float(batch_size)], dtype=jnp.float32)
    nvalid = jnp.array([batch_size], dtype=jnp.int32)

    grid = (B_pad // tb,)
    loss, l2 = pl.pallas_call(
        _bpr_loss_kernel,
        grid=grid,
        in_specs=[
            pl.BlockSpec(memory_space=pltpu.MemorySpace.SMEM),   # [l2_weight, 1/B]
            pl.BlockSpec(memory_space=pltpu.MemorySpace.SMEM),   # [batch_size]
            pl.BlockSpec((tb, D), lambda i: (i, 0)),
            pl.BlockSpec((tb, D), lambda i: (i, 0)),
            pl.BlockSpec((tb, D), lambda i: (i, 0)),
        ],
        out_specs=(pl.BlockSpec((1, 1), lambda i: (0, 0)),
                   pl.BlockSpec((1, 1), lambda i: (0, 0))),
        out_shape=(jax.ShapeDtypeStruct((1, 1), jnp.float32),
                   jax.ShapeDtypeStruct((1, 1), jnp.float32)),
        scratch_shapes=[pltpu.VMEM((1, 1), jnp.float32),   # softplus-sum accumulator
                        pltpu.VMEM((1, 1), jnp.float32)],  # reg-sum accumulator
        compiler_params=pltpu.CompilerParams(dimension_semantics=("arbitrary",)),
    )(params, nvalid, i_u, i_pos, i_neg)
    return loss[0, 0], l2[0, 0]


# ---------------------------------------------------------------------------
# Kernel 2: evaluate() matmul  scores = U @ B^T, tiled over (users, bundles).
# RHS is pre-transposed/padded to (D, NB_pad) so NB is the lane dimension.
# ---------------------------------------------------------------------------
def _eval_score_kernel(u_ref, bt_ref, out_ref):
    # bf16 x bf16 -> f32 accumulate on the MXU
    out_ref[...] = jnp.dot(u_ref[...], bt_ref[...],
                           preferred_element_type=jnp.float32)


def prepare_bundles_for_eval(bundles_feature, *, tn=EVAL_TN):
    """Transpose + pad + bf16-cast the bundle table once (cache across eval calls)."""
    NB, D = bundles_feature.shape
    NB_pad = _round_up(NB, tn)
    bt = bundles_feature.astype(jnp.bfloat16).T          # (D, NB)
    bt = jnp.pad(bt, ((0, 0), (0, NB_pad - NB)))          # (D, NB_pad), zero columns
    return bt


def evaluate_scores_pallas(users_embedding, bundles_t_bf16, num_bundles,
                           *, tm=EVAL_TM, tn=EVAL_TN):
    Be, D = users_embedding.shape
    D2, NB_pad = bundles_t_bf16.shape
    assert D == D2 and NB_pad % tn == 0

    tm = min(tm, _round_up(Be, 8))
    Be_pad = _round_up(Be, tm)
    u = users_embedding.astype(jnp.bfloat16)
    if Be_pad != Be:
        u = jnp.pad(u, ((0, Be_pad - Be), (0, 0)))

    grid = (Be_pad // tm, NB_pad // tn)
    cost = pl.CostEstimate(
        flops=2 * Be_pad * NB_pad * D,
        transcendentals=0,
        bytes_accessed=(grid[1] * Be_pad * D * 2       # U re-streamed per column block
                        + grid[0] * D * NB_pad * 2     # B^T re-streamed per row block
                        + Be_pad * NB_pad * 4),        # f32 output writeback
    )

    out = pl.pallas_call(
        _eval_score_kernel,
        grid=grid,
        in_specs=[pl.BlockSpec((tm, D), lambda i, j: (i, 0)),
                  pl.BlockSpec((D, tn), lambda i, j: (0, j))],
        out_specs=pl.BlockSpec((tm, tn), lambda i, j: (i, j)),
        out_shape=jax.ShapeDtypeStruct((Be_pad, NB_pad), jnp.float32),
        compiler_params=pltpu.CompilerParams(
            dimension_semantics=("parallel", "parallel")),
        cost_estimate=cost,
    )(u, bundles_t_bf16)
    return out[:Be, :num_bundles]


# ---------------------------------------------------------------------------
# BundleGT wrapper (JAX glue around the Pallas kernels).
# ---------------------------------------------------------------------------
class BundleGTPallas:
    def __init__(self, conf, key):
        self.embedding_size = conf['embedding_size']
        self.num_users = conf['num_users']
        self.num_bundles = conf['num_bundles']
        self.num_items = conf['num_items']
        self.embed_L2_norm = conf['l2_reg']

        ku, ki, kb = jax.random.split(key, 3)
        scale = 1.0 / math.sqrt(self.embedding_size)
        self.users_feature = (jax.random.normal(ku, (self.num_users, self.embedding_size),
                                                jnp.float32) * scale)
        self.items_feature = (jax.random.normal(ki, (self.num_items, self.embedding_size),
                                                jnp.float32) * scale)
        self.bundles_feature = (jax.random.normal(kb, (self.num_bundles, self.embedding_size),
                                                  jnp.float32) * scale)
        self._eval_bt_cache = None   # cached (D, NB_pad) bf16 transpose of bundle table

    def propagate(self):
        # TODO(synk): HGT() multi-layer graph propagation not reproducible (class not given);
        # return base embeddings (users_feature, items_feature, bundles_feature).
        return self.users_feature, self.items_feature, self.bundles_feature

    def forward(self, batch):
        users, bundles = batch            # users: (B, 1) int32, bundles: (B, 2) int32
        users_feature, _, bundles_features = self.propagate()
        B = users.shape[0]
        i_u = users_feature[users[:, 0]]              # (B, D)
        i_pos = bundles_features[bundles[:, 0]]       # (B, D) -> score[:, 0]
        i_neg = bundles_features[bundles[:, 1]]       # (B, D) -> score[:, 1]
        loss, l2 = bpr_loss_pallas(i_u, i_pos, i_neg, self.embed_L2_norm, B)
        return {'loss': loss, 'l2': l2}

    def evaluate(self, propagate_result, users):
        users_feature, _, bundles_feature = propagate_result
        if self._eval_bt_cache is None:
            # TODO(synk): invalidate this cache if propagate() output changes between calls.
            self._eval_bt_cache = prepare_bundles_for_eval(bundles_feature)
        users_embedding = users_feature[users]        # (Be, D)
        return evaluate_scores_pallas(users_embedding, self._eval_bt_cache,
                                      self.num_bundles)


if __name__ == "__main__":
    conf = {
        'embedding_size': 32,
        'num_users': 64,
        'num_bundles': 48,
        'num_items': 96,
        'l2_reg': 1e-4,
    }
    key = jax.random.PRNGKey(0)
    k_model, k_u, k_b = jax.random.split(key, 3)

    model = BundleGTPallas(conf, k_model)

    # ---- forward (training loss) ----
    B = 8
    users = jax.random.randint(k_u, (B, 1), 0, conf['num_users'], dtype=jnp.int32)
    bundles = jax.random.randint(k_b, (B, 2), 0, conf['num_bundles'], dtype=jnp.int32)
    losses = model.forward((users, bundles))
    loss = jax.block_until_ready(losses['loss'])
    l2 = jax.block_until_ready(losses['l2'])

    # reference in plain JAX (f32 throughout)
    uf, _, bf = model.propagate()
    iu = uf[users[:, 0]]
    ipos = bf[bundles[:, 0]]
    ineg = bf[bundles[:, 1]]
    s0 = jnp.sum(iu * ipos, -1)
    s1 = jnp.sum(iu * ineg, -1)
    ref_bpr = jnp.mean(jax.nn.softplus(s1 - s0))
    ref_reg = 0.5 * (jnp.sum(iu ** 2) + jnp.sum(ipos ** 2) + jnp.sum(ineg ** 2)) / B
    ref_l2 = conf['l2_reg'] * ref_reg
    ref_loss = ref_bpr + ref_l2
    assert jnp.allclose(loss, ref_loss, atol=1e-5, rtol=1e-5), (loss, ref_loss)
    assert jnp.allclose(l2, ref_l2, atol=1e-6, rtol=1e-5), (l2, ref_l2)

    # ---- evaluate (scoring matmul, bf16 operands / f32 accumulate) ----
    eval_users = jnp.arange(8, dtype=jnp.int32)
    scores = jax.block_until_ready(model.evaluate(model.propagate(), eval_users))
    u_bf = uf[eval_users].astype(jnp.bfloat16).astype(jnp.float32)
    b_bf = bf.astype(jnp.bfloat16).astype(jnp.float32)
    ref_scores = u_bf @ b_bf.T
    assert scores.shape == (8, conf['num_bundles'])
    assert jnp.allclose(scores, ref_scores, atol=2e-3, rtol=2e-3), (
        jnp.max(jnp.abs(scores - ref_scores)))

    print("KERNEL_OK")
</pallas_src>

<mosaic_0001>
module attributes {stable_mosaic.version = 11 : i64} {
  func.func @_bpr_loss_kernel(%arg0: i32, %arg1: memref<2xf32, #tpu.memory_space<smem>>, %arg2: memref<1xi32, #tpu.memory_space<smem>>, %arg3: memref<8x32xf32, #tpu.memory_space<vmem>>, %arg4: memref<8x32xf32, #tpu.memory_space<vmem>>, %arg5: memref<8x32xf32, #tpu.memory_space<vmem>>, %arg6: memref<1x1xf32, #tpu.memory_space<vmem>>, %arg7: memref<1x1xf32, #tpu.memory_space<vmem>>, %arg8: memref<1x1xf32, #tpu.memory_space<vmem>>, %arg9: memref<1x1xf32, #tpu.memory_space<vmem>>) attributes {dimension_semantics = [#tpu.dimension_semantics<arbitrary>], iteration_bounds = array<i64: 1>, scalar_prefetch = 0 : i64, scratch_operands = 2 : i64, tpu.core_type = #tpu.core_type<tc>, window_params = [{transform_indices = @transform_0, window_bounds = array<i64: 2>}, {transform_indices = @transform_1, window_bounds = array<i64: 1>}, {transform_indices = @transform_2, window_bounds = array<i64: 8, 32>}, {transform_indices = @transform_3, window_bounds = array<i64: 8, 32>}, {transform_indices = @transform_4, window_bounds = array<i64: 8, 32>}, {pipeline_mode = #tpu.pipeline_mode<synchronous>, transform_indices = @transform_5, window_bounds = array<i64: 1, 1>}, {pipeline_mode = #tpu.pipeline_mode<synchronous>, transform_indices = @transform_6, window_bounds = array<i64: 1, 1>}]} {
    %c0_i32 = arith.constant 0 : i32
    %0 = arith.cmpi eq, %arg0, %c0_i32 : i32
    %1 = arith.extui %0 : i1 to i32
    %c0_i32_0 = arith.constant 0 : i32
    %2 = arith.cmpi ne, %1, %c0_i32_0 : i32
    scf.if %2 {
      %cst_26 = arith.constant 0.000000e+00 : f32
      %63 = vector.broadcast %cst_26 : f32 to vector<1x1xf32>
      %c0_27 = arith.constant 0 : index
      %c0_28 = arith.constant 0 : index
      %64 = vector.load %arg8[%c0_27, %c0_28] : memref<1x1xf32, #tpu.memory_space<vmem>>, vector<1x1xf32>
      tpu.vector_store %arg8[%c0_27, %c0_28], %63 {strides = array<i32>} : memref<1x1xf32, #tpu.memory_space<vmem>>, vector<1x1xf32>,
      %cst_29 = arith.constant 0.000000e+00 : f32
      %65 = vector.broadcast %cst_29 : f32 to vector<1x1xf32>
      %c0_30 = arith.constant 0 : index
      %c0_31 = arith.constant 0 : index
      %66 = vector.load %arg9[%c0_30, %c0_31] : memref<1x1xf32, #tpu.memory_space<vmem>>, vector<1x1xf32>
      tpu.vector_store %arg9[%c0_30, %c0_31], %65 {strides = array<i32>} : memref<1x1xf32, #tpu.memory_space<vmem>>, vector<1x1xf32>,
    } else {
    }
    %c0 = arith.constant 0 : index
    %c0_1 = arith.constant 0 : index
    %3 = vector.load %arg3[%c0, %c0_1] : memref<8x32xf32, #tpu.memory_space<vmem>>, vector<8x32xf32>
    %c0_2 = arith.constant 0 : index
    %c0_3 = arith.constant 0 : index
    %4 = vector.load %arg4[%c0_2, %c0_3] : memref<8x32xf32, #tpu.memory_space<vmem>>, vector<8x32xf32>
    %c0_4 = arith.constant 0 : index
    %c0_5 = arith.constant 0 : index
    %5 = vector.load %arg5[%c0_4, %c0_5] : memref<8x32xf32, #tpu.memory_space<vmem>>, vector<8x32xf32>
    %6 = arith.mulf %3, %4 : vector<8x32xf32>
    %cst = arith.constant dense<0.000000e+00> : vector<8xf32>
    %7 = vector.multi_reduction <add>, %6, %cst [1] : vector<8x32xf32> to vector<8xf32>
    %8 = vector.shape_cast %7 : vector<8xf32> to vector<8x1xf32>
    %9 = arith.mulf %3, %5 : vector<8x32xf32>
    %cst_6 = arith.constant dense<0.000000e+00> : vector<8xf32>
    %10 = vector.multi_reduction <add>, %9, %cst_6 [1] : vector<8x32xf32> to vector<8xf32>
    %11 = vector.shape_cast %10 : vector<8xf32> to vector<8x1xf32>
    %12 = arith.subf %11, %8 : vector<8x1xf32>
    %cst_7 = arith.constant 0.000000e+00 : f32
    %13 = vector.broadcast %cst_7 : f32 to vector<8x1xf32>
    %14 = arith.maximumf %12, %13 : vector<8x1xf32>
    %15 = math.absf %12 : vector<8x1xf32>
    %cst_8 = arith.constant 0.000000e+00 : f32
    %16 = vector.broadcast %cst_8 : f32 to vector<8x1xf32>
    %17 = arith.subf %16, %15 : vector<8x1xf32>
    %18 = math.exp %17 : vector<8x1xf32>
    %19 = math.log1p %18 : vector<8x1xf32>
    %20 = arith.addf %14, %19 : vector<8x1xf32>
    %c8_i32 = arith.constant 8 : i32
    %21 = arith.muli %arg0, %c8_i32 : i32
    %22 = tpu.iota {dimensions = array<i32: 0>} : vector<8x1xi32>
    %23 = vector.broadcast %21 : i32 to vector<8x1xi32>
    %24 = arith.addi %23, %22 : vector<8x1xi32>
    %c0_9 = arith.constant 0 : index
    %25 = memref.load %arg2[%c0_9] : memref<1xi32, #tpu.memory_space<smem>>
    %26 = vector.broadcast %25 : i32 to vector<8x1xi32>
    %27 = arith.cmpi slt, %24, %26 : vector<8x1xi32>
    %cst_10 = arith.constant 0.000000e+00 : f32
    %28 = vector.broadcast %cst_10 : f32 to vector<8x1xf32>
    %29 = arith.select %27, %20, %28 : vector<8x1xi1>, vector<8x1xf32>
    %c0_11 = arith.constant 0 : index
    %c0_12 = arith.constant 0 : index
    %30 = vector.load %arg8[%c0_11, %c0_12] : memref<1x1xf32, #tpu.memory_space<vmem>>, vector<1x1xf32>
    %cst_13 = arith.constant dense<0.000000e+00> : vector<1xf32>
    %31 = vector.multi_reduction <add>, %29, %cst_13 [0] : vector<8x1xf32> to vector<1xf32>
    %32 = vector.shape_cast %31 : vector<1xf32> to vector<1x1xf32>
    %33 = arith.addf %30, %32 : vector<1x1xf32>
    %c0_14 = arith.constant 0 : index
    %c0_15 = arith.constant 0 : index
    %34 = vector.load %arg8[%c0_14, %c0_15] : memref<1x1xf32, #tpu.memory_space<vmem>>, vector<1x1xf32>
    tpu.vector_store %arg8[%c0_14, %c0_15], %33 {strides = array<i32>} : memref<1x1xf32, #tpu.memory_space<vmem>>, vector<1x1xf32>,
    %c0_16 = arith.constant 0 : index
    %c0_17 = arith.constant 0 : index
    %35 = vector.load %arg9[%c0_16, %c0_17] : memref<1x1xf32, #tpu.memory_space<vmem>>, vector<1x1xf32>
    %36 = arith.mulf %3, %3 : vector<8x32xf32>
    %37 = vector.shape_cast %36 : vector<8x32xf32> to vector<1x8x32xf32>
    %cst_18 = arith.constant dense<0.000000e+00> : vector<1xf32>
    %38 = vector.multi_reduction <add>, %37, %cst_18 [1, 2] : vector<1x8x32xf32> to vector<1xf32>
    %39 = vector.shape_cast %38 : vector<1xf32> to vector<1x1x1xf32>
    %40 = vector.extract %39[0, 0, 0] : f32 from vector<1x1x1xf32>
    %41 = vector.broadcast %40 : f32 to vector<1x1xf32>
    %42 = arith.mulf %4, %4 : vector<8x32xf32>
    %43 = vector.shape_cast %42 : vector<8x32xf32> to vector<1x8x32xf32>
    %cst_19 = arith.constant dense<0.000000e+00> : vector<1xf32>
    %44 = vector.multi_reduction <add>, %43, %cst_19 [1, 2] : vector<1x8x32xf32> to vector<1xf32>
    %45 = vector.shape_cast %44 : vector<1xf32> to vector<1x1x1xf32>
    %46 = vector.extract %45[0, 0, 0] : f32 from vector<1x1x1xf32>
    %47 = vector.broadcast %46 : f32 to vector<1x1xf32>
    %48 = arith.addf %41, %47 : vector<1x1xf32>
    %49 = arith.mulf %5, %5 : vector<8x32xf32>
    %50 = vector.shape_cast %49 : vector<8x32xf32> to vector<1x8x32xf32>
    %cst_20 = arith.constant dense<0.000000e+00> : vector<1xf32>
    %51 = vector.multi_reduction <add>, %50, %cst_20 [1, 2] : vector<1x8x32xf32> to vector<1xf32>
    %52 = vector.shape_cast %51 : vector<1xf32> to vector<1x1x1xf32>
    %53 = vector.extract %52[0, 0, 0] : f32 from vector<1x1x1xf32>
    %54 = vector.broadcast %53 : f32 to vector<1x1xf32>
    %55 = arith.addf %48, %54 : vector<1x1xf32>
    %cst_21 = arith.constant 5.000000e-01 : f32
    %56 = vector.broadcast %cst_21 : f32 to vector<1x1xf32>
    %57 = arith.mulf %56, %55 : vector<1x1xf32>
    %58 = arith.addf %35, %57 : vector<1x1xf32>
    %c0_22 = arith.constant 0 : index
    %c0_23 = arith.constant 0 : index
    %59 = vector.load %arg9[%c0_22, %c0_23] : memref<1x1xf32, #tpu.memory_space<vmem>>, vector<1x1xf32>
    tpu.vector_store %arg9[%c0_22, %c0_23], %58 {strides = array<i32>} : memref<1x1xf32, #tpu.memory_space<vmem>>, vector<1x1xf32>,
    %c0_i32_24 = arith.constant 0 : i32
    %60 = arith.cmpi eq, %arg0, %c0_i32_24 : i32
    %61 = arith.extui %60 : i1 to i32
    %c0_i32_25 = arith.constant 0 : i32
    %62 = arith.cmpi ne, %61, %c0_i32_25 : i32
    scf.if %62 {
      %c0_26 = arith.constant 0 : index
      %63 = memref.load %arg1[%c0_26] : memref<2xf32, #tpu.memory_space<smem>>
      %c1 = arith.constant 1 : index
      %64 = memref.load %arg1[%c1] : memref<2xf32, #tpu.memory_space<smem>>
      %c0_27 = arith.constant 0 : index
      %c0_28 = arith.constant 0 : index
      %65 = vector.load %arg8[%c0_27, %c0_28] : memref<1x1xf32, #tpu.memory_space<vmem>>, vector<1x1xf32>
      %66 = vector.broadcast %64 : f32 to vector<1x1xf32>
      %67 = arith.mulf %65, %66 : vector<1x1xf32>
      %c0_29 = arith.constant 0 : index
      %c0_30 = arith.constant 0 : index
      %68 = vector.load %arg9[%c0_29, %c0_30] : memref<1x1xf32, #tpu.memory_space<vmem>>, vector<1x1xf32>
      %69 = vector.broadcast %64 : f32 to vector<1x1xf32>
      %70 = arith.mulf %68, %69 : vector<1x1xf32>
      %71 = vector.broadcast %63 : f32 to vector<1x1xf32>
      %72 = arith.mulf %70, %71 : vector<1x1xf32>
      %c0_31 = arith.constant 0 : index
      %c0_32 = arith.constant 0 : index
      %73 = vector.load %arg7[%c0_31, %c0_32] : memref<1x1xf32, #tpu.memory_space<vmem>>, vector<1x1xf32>
      tpu.vector_store %arg7[%c0_31, %c0_32], %72 {strides = array<i32>} : memref<1x1xf32, #tpu.memory_space<vmem>>, vector<1x1xf32>,
      %74 = arith.addf %67, %72 : vector<1x1xf32>
      %c0_33 = arith.constant 0 : index
      %c0_34 = arith.constant 0 : index
      %75 = vector.load %arg6[%c0_33, %c0_34] : memref<1x1xf32, #tpu.memory_space<vmem>>, vector<1x1xf32>
      tpu.vector_store %arg6[%c0_33, %c0_34], %74 {strides = array<i32>} : memref<1x1xf32, #tpu.memory_space<vmem>>, vector<1x1xf32>,
    } else {
    }
    return
  }
  func.func @transform_0(%arg0: i32) -> i32 {
    %c0_i32 = arith.constant 0 : i32
    %c0_i32_0 = arith.constant 0 : i32
    return %c0_i32 : i32
  }
  func.func @transform_1(%arg0: i32) -> i32 {
    %c0_i32 = arith.constant 0 : i32
    %c0_i32_0 = arith.constant 0 : i32
    return %c0_i32 : i32
  }
  func.func @transform_2(%arg0: i32) -> (i32, i32) {
    %c0_i32 = arith.constant 0 : i32
    %c0_i32_0 = arith.constant 0 : i32
    return %arg0, %c0_i32 : i32, i32
  }
  func.func @transform_3(%arg0: i32) -> (i32, i32) {
    %c0_i32 = arith.constant 0 : i32
    %c0_i32_0 = arith.constant 0 : i32
    return %arg0, %c0_i32 : i32, i32
  }
  func.func @transform_4(%arg0: i32) -> (i32, i32) {
    %c0_i32 = arith.constant 0 : i32
    %c0_i32_0 = arith.constant 0 : i32
    return %arg0, %c0_i32 : i32, i32
  }
  func.func @transform_5(%arg0: i32) -> (i32, i32) {
    %c0_i32 = arith.constant 0 : i32
    %c0_i32_0 = arith.constant 0 : i32
    %c0_i32_1 = arith.constant 0 : i32
    return %c0_i32, %c0_i32_0 : i32, i32
  }
  func.func @transform_6(%arg0: i32) -> (i32, i32) {
    %c0_i32 = arith.constant 0 : i32
    %c0_i32_0 = arith.constant 0 : i32
    %c0_i32_1 = arith.constant 0 : i32
    return %c0_i32, %c0_i32_0 : i32, i32
  }
}

</mosaic_0001>

<bundles_post_ra>
// kernel: tpu_custom_call.1
= control target key start
LH: loop header
LB: loop body
LE: loop exit
PB: predicated region body
PF: predicated region fallthrough
CT: control target
= control target key end

     0   :  { %13 = vsyncpa [#allocation8], 0  ;;  %s429_s0 = inlined_call_operand.vmem [shape: f32[2], index: 0, kind: input, shape index: {}]   ;;  %s430_s1 = inlined_call_operand.<no memory space> [shape: s32[1], index: 1, kind: input, shape index: {}]   ;;  %s431_s2 = inlined_call_operand.hbm [shape: f32[8,32], index: 2, kind: input, shape index: {}]   ;;  %s432_s3 = inlined_call_operand.hbm [shape: f32[8,32], index: 3, kind: input, shape index: {}]   ;;  %s433_s4 = inlined_call_operand.hbm [shape: f32[8,32], index: 4, kind: input, shape index: {}]   ;;  %s434_s5 = inlined_call_operand.hbm [shape: f32[1,1], index: 5, kind: output, shape index: {0}]   ;;  %s435_s6 = inlined_call_operand.hbm [shape: f32[1,1], index: 6, kind: output, shape index: {1}]  }
   0x1   :  { %14 = vsyncpa [#allocation6], 0 }
   0x2   :  { %15 = vsyncpa [#allocation11], 0 }
   0x3   :  { %16 = vsyncpa [#allocation7], 0 }
   0x4   :  { %17 = vsyncpa [#allocation15], 0  ;;  %s24_s23 = sshll.u32 %s429_s0, 4  ;;  %s355_s24 = smov [#allocation10]   ;;  %s25_s23 = int_to_ptr.vmem [resolvable:$true] %s24_s23 }
   0x5   :  { %s46_s25 = sshll.u32 %s355_s24, 4  ;;  %s47_s25 = int_to_ptr.vmem [resolvable:$true] %s46_s25 }
   0x6   :  { %s241_s26 = scalar_lea.vmem %s47_s25, 128  ;;  %p246_p1 = scmp.lt.s32.totalorder %s47_s25, %s47_s25 }
   0x7   :  { %p242_p0 = scmp.ne.s32.totalorder %s47_s25, %s241_s26  ;;  %p247_p2 = scmp.lt.s32.totalorder %s241_s26, %s241_s26 }
   0x9   :  { %p248_p3 = por %p247_p2, %p246_p1 }
   0xb   :  { %p249_p4 = pnand %p248_p3, %p242_p0 }
   0xd   :  { %252 = shalt.err (!%p249_p4)
}
   0xe   :  { %49 = dma.hbm_to_vmem [thread:$0]  %s432_s3, 128, %s47_s25, [#allocation11]  }
   0xf   :  { %s253_s29 = scalar_lea.vmem %s25_s23, 16  ;;  %p258_p6 = scmp.lt.s32.totalorder %s25_s23, %s25_s23 }
  0x10   :  { %p254_p5 = scmp.ne.s32.totalorder %s25_s23, %s253_s29  ;;  %p259_p7 = scmp.lt.s32.totalorder %s253_s29, %s253_s29 }
  0x12   :  { %p260_p8 = por %p259_p7, %p258_p6 }
  0x14   :  { %p261_p9 = pnand %p260_p8, %p254_p5 }
  0x16   :  { %264 = shalt.err (!%p261_p9)
}
  0x17   :  { %s356_s0 = smov [#allocation5]   ;;  %s357_s30 = smov [#allocation9]  }
  0x18   :  { %27 = dma.vmem_to_smem %s25_s23, 16, %s356_s0, [#allocation8]  }
  0x19   :  { %s36_s7 = sshll.u32 %s357_s30, 4  ;;  %s358_s8 = smov [#allocation12]   ;;  %s37_s7 = int_to_ptr.vmem [resolvable:$true] %s36_s7 }
  0x1a   :  { %s56_s9 = sshll.u32 %s358_s8, 4  ;;  %s273_s10 = scalar_lea.vmem %s37_s7, 128  ;;  %s57_s9 = int_to_ptr.vmem [resolvable:$true] %s56_s9 }
  0x1b   :  { %p274_p10 = scmp.ne.s32.totalorder %s37_s7, %s273_s10  ;;  %p278_p11 = scmp.lt.s32.totalorder %s37_s7, %s37_s7 }
  0x1c   :  { %p279_p12 = scmp.lt.s32.totalorder %s273_s10, %s273_s10 }
  0x1e   :  { %p280_p13 = por %p279_p12, %p278_p11 }
  0x20   :  { %p281_p0 = pnand %p280_p13, %p274_p10 }
  0x22   :  { %284 = shalt.err (!%p281_p0)
}
  0x23   :  { %39 = dma.hbm_to_vmem [thread:$0]  %s431_s2, 128, %s37_s7, [#allocation6]  }
  0x24   :  { %s293_s12 = scalar_lea.vmem %s57_s9, 128  ;;  %p298_p2 = scmp.lt.s32.totalorder %s57_s9, %s57_s9 }
  0x25   :  { %p294_p1 = scmp.ne.s32.totalorder %s57_s9, %s293_s12  ;;  %p299_p3 = scmp.lt.s32.totalorder %s293_s12, %s293_s12 }
  0x27   :  { %p300_p4 = por %p299_p3, %p298_p2 }
  0x29   :  { %p301_p5 = pnand %p300_p4, %p294_p1 }
  0x2b   :  { %304 = shalt.err (!%p301_p5)
}
  0x2c   :  { %59 = dma.hbm_to_vmem [thread:$0]  %s433_s4, 128, %s57_s9, [#allocation11]  }
  0x2d   :  { %345 = dma.done.wait [#allocation8], 16  }
  0x2e   :  { %346 = vsyncadd [#allocation8], 4294967280 }
  0x2f   :  { %347 = dma.done.wait [#allocation6], 128  }
  0x30   :  { %348 = vsyncadd [#allocation6], 4294967168 }
  0x31   :  { %349 = dma.done.wait [#allocation11], 256  }
  0x32   :  { %350 = vsyncadd [#allocation11], 4294967040 }
  0x33   :  { %72 = sfence }
  0x34   :  { %v82_v0 = vld [vmem:[#allocation12] sm:$0xff]  ;;  %vm84_vm0 = vcmask 261120   ;;  %v80_v1 = vld [vmem:[#allocation9] sm:$0xff]  ;;  %v81_v2 = vld [vmem:[#allocation10] sm:$0xff]  ;;  %vm77_vm1 = vcmask 0   ;;  %v359_v13 = vmov 0.0   ;;  %v109_v44 = vlaneseq }
  0x35   :  { %v153_v3 = vmul.f32 %v82_v0, %v82_v0  ;;  %v128_v4 = vmul.f32 %v80_v1, %v80_v1  ;;  %v140_v5 = vmul.f32 %v81_v2, %v81_v2  ;;  %v83_v6 = vmul.f32 %v81_v2, %v80_v1  ;;  %78 = vst.msk [vmem:[#allocation2] sm:$0x1] %vm77_vm1, %v359_v13  ;;  %s215_s17 = sld [smem:[#allocation5 + $0x1]]  ;;  %s360_s19 = smov [#allocation14]  }
  0x36   :  { %v88_v10 = vmul.f32 %v82_v0, %v80_v1  ;;  %79 = vst.msk [vmem:[#allocation3] sm:$0x1] %vm77_vm1, %v359_v13  ;;  %v110_v47 = vshrl.u32 %v109_v44, 7  ;;  %v114_v49 = vstv %s430_s1  ;;  %s172_s18 = sld [smem:[#allocation5]]  ;;  %s200_s20 = sshll.u32 %s360_s19, 4  ;;  %s201_s20 = int_to_ptr.vmem [resolvable:$true] %s200_s20 }
  0x37   :  { %v154_v7 = vsel %vm84_vm0, %v153_v3, 0.0  ;;  %v129_v8 = vsel %vm84_vm0, %v128_v4, 0.0  ;;  %v141_v9 = vsel %vm84_vm0, %v140_v5, 0.0  ;;  %v85_v11 = vsel %vm84_vm0, %v83_v6, 0.0  ;;  %s361_s21 = smov [#allocation13]   ;;  %s305_s23 = scalar_lea.vmem %s201_s20, 16 }
  0x38   :  { %155 = vadd.xlane.f32.xlu1 %v154_v7  ;;  %130 = vadd.xlane.f32.xlu0 %v129_v8  ;;  %v89_v12 = vsel %vm84_vm0, %v88_v10, 0.0  ;;  %vm115_vm3 = vcmp.lt.s32.totalorder %v110_v47, %v114_v49  ;;  %s190_s22 = sshll.u32 %s361_s21, 4  ;;  %p306_p6 = scmp.ne.s32.totalorder %s201_s20, %s305_s23  ;;  %s191_s22 = int_to_ptr.vmem [resolvable:$true] %s190_s22 }
  0x39   :  { %s309_s24 = scalar_lea.vmem %s201_s20, 32  ;;  %p310_p7 = scmp.lt.s32.totalorder %s201_s20, %s201_s20 }
  0x3a   :  { %p311_p8 = scmp.lt.s32.totalorder %s309_s24, %s305_s23 }
  0x3c   :  { %142 = vadd.xlane.f32.xlu0 %v141_v9  ;;  %86 = vadd.xlane.f32.xlu1 %v85_v11  ;;  %v117_v61 = vld [vmem:[#allocation2] sm:$0x1]  ;;  %v175_v9 = vstv %s215_s17  ;;  %v179_v11 = vstv %s172_s18  ;;  %p312_p9 = por %p311_p8, %p310_p7 }
  0x3d   :  { %v127_v5 = vld [vmem:[#allocation3] sm:$0x1] }
  0x3e   :  { %p313_p10 = pnand %p312_p9, %p306_p6 }
  0x40   :  { %90 = vadd.xlane.f32.xlu0 %v89_v12 }
  0xc1   :  { %v156_v14 = vpop.xlane.xlu1 %155  ;;  %v131_v15 = vpop.xlane.xlu0 %130 }
  0xc2   :  { %v157_v16 = vrot.slane %v156_v14, 4  ;;  %v132_v17 = vrot.slane %v131_v15, 4 }
  0xc4   :  { %v158_v18 = vadd.f32 %v157_v16, %v156_v14  ;;  %v133_v19 = vadd.f32 %v132_v17, %v131_v15 }
  0xc5   :  { %v143_v20 = vpop.xlane.xlu0 %142  ;;  %v87_v24 = vpop.xlane.xlu1 %86 }
  0xc6   :  { %v159_v21 = vrot.slane %v158_v18, 2  ;;  %v134_v22 = vrot.slane %v133_v19, 2  ;;  %v144_v23 = vrot.slane %v143_v20, 4 }
  0xc8   :  { %v145_v25 = vadd.f32 %v144_v23, %v143_v20  ;;  %v135_v26 = vadd.f32 %v134_v22, %v133_v19  ;;  %v160_v28 = vadd.f32 %v159_v21, %v158_v18 }
  0xc9   :  { %v91_v27 = vpop.xlane.xlu0 %90 }
  0xca   :  { %v146_v29 = vrot.slane %v145_v25, 2  ;;  %v92_v30 = vsub.f32 %v91_v27, %v87_v24  ;;  %v136_v31 = vrot.slane %v135_v26, 1  ;;  %v161_v35 = vrot.slane %v160_v28, 1 }
  0xcc   :  { %v94_v32 = vand.u32 2147483647, %v92_v30  ;;  %v137_v33 = vadd.f32 %v136_v31, %v135_v26  ;;  %v147_v34 = vadd.f32 %v146_v29, %v145_v25  ;;  %v162_v40 = vadd.f32 %v161_v35, %v160_v28 }
  0xcd   :  { %v93_v52 = vmax.f32 %v92_v30, 0.0 }
  0xce   :  { %v95_v36 = vsub.f32 0.0, %v94_v32  ;;  %216 = vpush %v137_v33  ;;  %v148_v37 = vrot.slane %v147_v34, 1 }
  0xd0   :  { %v96_v38 = vmul.f32 1.442695, %v95_v36  ;;  %v149_v39 = vadd.f32 %v148_v37, %v147_v34 }
  0xd2   :  { %229 = vpow2.f32 %v96_v38  ;;  %218 = vpush %v149_v39 }
  0xd3   :  { %220 = vpush %v162_v40 }
  0xdf   :  { %v230_v41 = vpop.eup %229 }
  0xe0   :  { %v98_v42 = vadd.f32 1.0, %v230_v41  ;;  %v101_v43 = vmul.f32 -0.5, %v230_v41  ;;  %v104_v46 = vand.u32 2147483647, %v230_v41 }
  0xe2   :  { %231 = vlog2.f32 %v98_v42  ;;  %v102_v45 = vadd.f32 1.0, %v101_v43  ;;  %vm105_vm2 = vcmp.lt.f32.partialorder %v104_v46, 0.0004427343 }
  0xe4   :  { %v103_v51 = vmul.f32 %v230_v41, %v102_v45 }
  0xef   :  { %v232_v48 = vpop.eup %231 }
  0xf0   :  { %v100_v50 = vmul.f32 0.6931472, %v232_v48 }
  0xf2   :  { %v106_v53 = vsel %vm105_vm2, %v103_v51, %v100_v50 }
  0xf3   :  { %v107_v54 = vadd.f32 %v106_v53, %v93_v52 }
  0xf5   :  { %v116_v55 = vsel %vm115_vm3, %v107_v54, 0.0 }
  0xf6   :  { %v118_v56 = vrot.slane %v116_v55, 4 }
  0xf8   :  { %v119_v57 = vadd.f32 %v118_v56, %v116_v55 }
  0xfa   :  { %v120_v58 = vrot.slane %v119_v57, 2 }
  0xfc   :  { %v121_v59 = vadd.f32 %v120_v58, %v119_v57 }
  0xfe   :  { %v122_v60 = vrot.slane %v121_v59, 1 }
  0xff   :  { %s217_s15 = spop %216 }
 0x100   :  { %v123_v62 = vadd.f32 %v122_v60, %v121_v59  ;;  %v139_v0 = vstv %s217_s15 }
 0x102   :  { %v124_v63 = vadd.f32 %v123_v62, %v117_v61 }
 0x103   :  { %s219_s16 = spop %218 }
 0x104   :  { %v151_v1 = vstv %s219_s16  ;;  %s221_s1 = spop %220  ;;  %126 = vst.msk [vmem:[#allocation2] sm:$0x1] %vm77_vm1, %v124_v63 }
 0x105   :  { %v152_v2 = vadd.f32 %v151_v1, %v139_v0  ;;  %v164_v3 = vstv %s221_s1 }
 0x107   :  { %v165_v4 = vadd.f32 %v164_v3, %v152_v2 }
 0x109   :  { %v166_v6 = vmul.f32 0.5, %v165_v4 }
 0x10b   :  { %v167_v7 = vadd.f32 %v166_v6, %v127_v5  ;;  %v174_v8 = vld [vmem:[#allocation2] sm:$0x1] }
 0x10c   :  { %v176_v13 = vmul.f32 %v175_v9, %v174_v8 }
 0x10d   :  { %168 = vst.msk [vmem:[#allocation3] sm:$0x1] %vm77_vm1, %v167_v7 }
 0x114   :  { %v177_v10 = vld [vmem:[#allocation3] sm:$0x1] }
 0x115   :  { %v178_v12 = vmul.f32 %v177_v10, %v175_v9 }
 0x117   :  { %v180_v14 = vmul.f32 %v179_v11, %v178_v12 }
 0x119   :  { %v182_v15 = vadd.f32 %v180_v14, %v176_v13  ;;  %181 = vst.msk [vmem:[#allocation14] sm:$0x1] %vm77_vm1, %v180_v14 }
 0x11a   :  { %316 = shalt.err (!%p313_p10)
}
 0x11b   :  { %203 = dma.vmem_to_hbm [thread:$0]  %s201_s20, 16, %s435_s6, [#allocation15]   ;;  %183 = vst.msk [vmem:[#allocation13] sm:$0x1] %vm77_vm1, %v182_v15 }
 0x11c   :  { %s325_s27 = scalar_lea.vmem %s191_s22, 16  ;;  %s329_s28 = scalar_lea.vmem %s191_s22, 32 }
 0x11d   :  { %p326_p11 = scmp.ne.s32.totalorder %s191_s22, %s325_s27  ;;  %p330_p12 = scmp.lt.s32.totalorder %s191_s22, %s191_s22 }
 0x11e   :  { %p331_p13 = scmp.lt.s32.totalorder %s329_s28, %s325_s27 }
 0x120   :  { %p332_p0 = por %p331_p13, %p330_p12 }
 0x122   :  { %p333_p1 = pnand %p332_p0, %p326_p11 }
 0x124   :  { %336 = shalt.err (!%p333_p1)
}
 0x125   :  { %193 = dma.vmem_to_hbm [thread:$0]  %s191_s22, 16, %s434_s5, [#allocation7]  }
 0x126   :  { %351 = dma.done.wait [#allocation7], 16  }
 0x127   :  { %352 = vsyncadd [#allocation7], 4294967280 }
 0x128   :  { %353 = dma.done.wait [#allocation15], 16  }
 0x129   :  { %354 = vsyncadd [#allocation15], 4294967280 }
 0x12a   :  { %210 = vsyncpa [#allocation6], 1 }
 0x12b   :  { %211 = vsyncpa [#allocation11], 1 }
 0x12c   :  { %212 = vsyncpa [#allocation7], 1 }
 0x12d   :  { %213 = vsyncpa [#allocation15], 1 }
 0x12e   :  { %214 = vsyncpa [#allocation8], 1 }

</bundles_post_ra>
